<compile_context>
chip_gen: v7x
topology: tpu7x:2x2x1
jax: 0.10.0
libtpu: 0.0.40
codegen_flags: <defaults>
</compile_context>

<pallas_src>
import jax
import jax.numpy as jnp
from jax.experimental import pallas as pl
from jax.experimental.pallas import tpu as pltpu

NEG_SLOPE = 0.01      # F.leaky_relu default
H1, H2 = 256, 128     # fc1 / fc2 widths from the PyTorch module


def _round_up(x, m):
    return -(-x // m) * m


def _leaky_relu(x):
    # slope < 1  =>  leaky_relu(x) == max(x, slope*x); cheaper than where().
    return jnp.maximum(x, NEG_SLOPE * x)


def critic_kernel(state_ref, action_ref, w1_ref, b1_ref, w2s_ref, w2a_ref,
                  b2_ref, w3_ref, b3_ref, q_ref):
    # In-kernel f32 -> bf16 cast (VPU); avoids any extra wrapper HBM pass.
    s = state_ref[...].astype(jnp.bfloat16)
    a = action_ref[...].astype(jnp.bfloat16)

    # fc1: (bb, S) @ (S, 256) -> f32 accumulate, bias + leaky in f32.
    h1 = _leaky_relu(
        jnp.dot(s, w1_ref[...], preferred_element_type=jnp.float32)
        + b1_ref[...])

    # action branch of fc2: (bb, A) @ (A, 128).
    act_c = jnp.dot(a, w2a_ref[...], preferred_element_type=jnp.float32)

    # fc2: (bb, 256) @ (256, 128) + action branch + bias, leaky in f32.
    h2 = _leaky_relu(
        jnp.dot(h1.astype(jnp.bfloat16), w2s_ref[...],
                preferred_element_type=jnp.float32)
        + act_c + b2_ref[...])

    # qval head, lane-dense: contract H2 of (1, H2) x (bb, H2) -> (1, bb) row
    # directly from the MXU (no (bb, 1) masked column stores).
    q = jax.lax.dot_general(
        w3_ref[...], h2.astype(jnp.bfloat16),
        dimension_numbers=(((1,), (1,)), ((), ())),
        preferred_element_type=jnp.float32) + b3_ref[0]
    q_ref[...] = q


def critic_forward(state, action, packed, *, block_b=2048):
    """state: (B, state_size) f32, action: (B, action_size) f32 -> (B,) q."""
    B, S = state.shape
    A = action.shape[1]
    w1, b1, w2s, w2a, b2, w3_row, b3 = packed

    # Batch tile:
    #  - B <= 256: one full-extent block (block == array dims, no pad/edge).
    #  - B  > 256: >= 2 blocks (keeps v7x's 2nd TensorCore busy), each a
    #    multiple of 128 rows so the lane-dense (1, bb) output block is legal;
    #    a non-divisible final block is handled by Pallas edge masking
    #    (garbage pad rows are row-independent and sliced off below).
    if B <= 256:
        bb = B
    else:
        bb = _round_up(min(block_b, -(-B // 2)), 128)
    nb = -(-B // bb)
    Bp = nb * bb

    flops = 2 * B * (S * H1 + A * H2 + H1 * H2 + H2)
    bytes_accessed = (B * (S + A) * 4 + Bp * 4
                      + (w1.size + w2s.size + w2a.size + w3_row.size) * 2
                      + (b1.size + b2.size + b3.size) * 4)

    grid_spec = pltpu.PrefetchScalarGridSpec(
        num_scalar_prefetch=0,
        grid=(nb,),
        in_specs=[
            pl.BlockSpec((bb, S), lambda i: (i, 0)),            # streamed state tile
            pl.BlockSpec((bb, A), lambda i: (i, 0)),            # streamed action tile
            pl.BlockSpec((S, H1), lambda i: (0, 0)),            # resident fc1 weight
            pl.BlockSpec((1, H1), lambda i: (0, 0)),            # resident fc1 bias
            pl.BlockSpec((H1, H2), lambda i: (0, 0)),           # resident fc2 (h1 part)
            pl.BlockSpec((A, H2), lambda i: (0, 0)),            # resident fc2 (action part)
            pl.BlockSpec((1, H2), lambda i: (0, 0)),            # resident fc2 bias
            pl.BlockSpec((1, H2), lambda i: (0, 0)),            # resident qval weight row
            pl.BlockSpec(memory_space=pltpu.MemorySpace.SMEM),  # qval bias scalar
        ],
        out_specs=pl.BlockSpec((1, bb), lambda i: (0, i)),      # lane-dense q row
    )

    q = pl.pallas_call(
        critic_kernel,
        out_shape=jax.ShapeDtypeStruct((1, Bp), jnp.float32),
        grid_spec=grid_spec,
        compiler_params=pltpu.CompilerParams(
            dimension_semantics=("parallel",)),   # v7x: shard batch blocks over 2 TCs
        cost_estimate=pl.CostEstimate(
            flops=int(flops), transcendentals=0,
            bytes_accessed=int(bytes_accessed)),
    )(state, action, w1, b1, w2s, w2a, b2, w3_row, b3)

    return q[0, :B]   # matches torch .squeeze()


def init_params(key, state_size, action_size):
    """Deterministic synthetic init matching the PyTorch init scheme
    (kaiming_normal for fc1/fc2 weights, xavier_normal for qval weight)."""
    k = jax.random.split(key, 6)
    w1 = jax.random.normal(k[0], (state_size, H1), jnp.float32) * jnp.sqrt(2.0 / state_size)
    w2 = jax.random.normal(k[1], (H1 + action_size, H2), jnp.float32) * jnp.sqrt(2.0 / (H1 + action_size))
    w3 = jax.random.normal(k[2], (H2, 1), jnp.float32) * jnp.sqrt(2.0 / (H2 + 1))
    b1 = jax.random.uniform(k[3], (1, H1), jnp.float32,
                            -1.0 / jnp.sqrt(state_size), 1.0 / jnp.sqrt(state_size))
    b2 = jax.random.uniform(k[4], (1, H2), jnp.float32,
                            -1.0 / jnp.sqrt(H1 + action_size), 1.0 / jnp.sqrt(H1 + action_size))
    b3 = jax.random.uniform(k[5], (1, 1), jnp.float32,
                            -1.0 / jnp.sqrt(H2), 1.0 / jnp.sqrt(H2))
    # fc2 split: part that multiplies h1 vs the part that multiplies action.
    w2s, w2a = w2[:H1, :], w2[H1:, :]
    return (w1, b1, w2s, w2a, b2, w3, b3)


def pack_params(params):
    """Build kernel operands once (bf16 weights, biases in f32)."""
    w1, b1, w2s, w2a, b2, w3, b3 = params
    return (w1.astype(jnp.bfloat16),
            b1,
            w2s.astype(jnp.bfloat16),
            w2a.astype(jnp.bfloat16),
            b2,
            w3.reshape(1, H2).astype(jnp.bfloat16),   # qval weight as a bf16 row
            b3.reshape(1).astype(jnp.float32))        # qval bias scalar (SMEM)


def reference_forward(state, action, params):
    """Pure-JAX reference using the same bf16-operand / f32-accumulate math."""
    w1, b1, w2s, w2a, b2, w3, b3 = params

    def bdot(a, b):
        return jnp.dot(a.astype(jnp.bfloat16), b.astype(jnp.bfloat16),
                       preferred_element_type=jnp.float32)

    h1 = _leaky_relu(bdot(state, w1) + b1)
    h2 = _leaky_relu(bdot(h1, w2s) + bdot(action, w2a) + b2)
    return jnp.squeeze(bdot(h2, w3) + b3)


if __name__ == "__main__":
    key = jax.random.PRNGKey(0)
    state_size, action_size = 16, 4
    pk = jax.random.fold_in(key, 7)
    params = init_params(pk, state_size, action_size)
    packed = pack_params(params)

    # batch=8: single full-extent block; batch=300: 2 blocks of 256 rows
    # (exercises the parallel grid, lane-dense multi-block output and the
    # masked edge block).
    for batch in (8, 300):
        sk, ak = jax.random.split(jax.random.fold_in(key, batch))
        state = jax.random.normal(sk, (batch, state_size), jnp.float32)
        action = jax.random.normal(ak, (batch, action_size), jnp.float32)

        q = critic_forward(state, action, packed)
        jax.block_until_ready(q)

        q_ref = reference_forward(state, action, params)
        assert q.shape == (batch,)
        assert jnp.allclose(q, q_ref, atol=2e-3, rtol=2e-3), (batch, q, q_ref)

    print("KERNEL_OK")
</pallas_src>

<mosaic_0001>
module attributes {stable_mosaic.version = 11 : i64} {
  func.func @critic_kernel(%arg0: i32, %arg1: memref<8x16xf32, #tpu.memory_space<vmem>>, %arg2: memref<8x4xf32, #tpu.memory_space<vmem>>, %arg3: memref<16x256xbf16, #tpu.memory_space<vmem>>, %arg4: memref<1x256xf32, #tpu.memory_space<vmem>>, %arg5: memref<256x128xbf16, #tpu.memory_space<vmem>>, %arg6: memref<4x128xbf16, #tpu.memory_space<vmem>>, %arg7: memref<1x128xf32, #tpu.memory_space<vmem>>, %arg8: memref<1x128xbf16, #tpu.memory_space<vmem>>, %arg9: memref<1xf32, #tpu.memory_space<smem>>, %arg10: memref<1x8xf32, #tpu.memory_space<vmem>>) attributes {dimension_semantics = [#tpu.dimension_semantics<parallel>], iteration_bounds = array<i64: 1>, scalar_prefetch = 0 : i64, scratch_operands = 0 : i64, tpu.core_type = #tpu.core_type<tc>, window_params = [{transform_indices = @transform_0, window_bounds = array<i64: 8, 16>}, {transform_indices = @transform_1, window_bounds = array<i64: 8, 4>}, {pipeline_mode = #tpu.pipeline_mode<synchronous>, transform_indices = @transform_2, window_bounds = array<i64: 16, 256>}, {pipeline_mode = #tpu.pipeline_mode<synchronous>, transform_indices = @transform_3, window_bounds = array<i64: 1, 256>}, {pipeline_mode = #tpu.pipeline_mode<synchronous>, transform_indices = @transform_4, window_bounds = array<i64: 256, 128>}, {pipeline_mode = #tpu.pipeline_mode<synchronous>, transform_indices = @transform_5, window_bounds = array<i64: 4, 128>}, {pipeline_mode = #tpu.pipeline_mode<synchronous>, transform_indices = @transform_6, window_bounds = array<i64: 1, 128>}, {pipeline_mode = #tpu.pipeline_mode<synchronous>, transform_indices = @transform_7, window_bounds = array<i64: 1, 128>}, {transform_indices = @transform_8, window_bounds = array<i64: 1>}, {transform_indices = @transform_9, window_bounds = array<i64: 1, 8>}]} {
    %c0 = arith.constant 0 : index
    %c0_0 = arith.constant 0 : index
    %0 = vector.load %arg1[%c0, %c0_0] : memref<8x16xf32, #tpu.memory_space<vmem>>, vector<8x16xf32>
    %1 = arith.truncf %0 : vector<8x16xf32> to vector<8x16xbf16>
    %c0_1 = arith.constant 0 : index
    %c0_2 = arith.constant 0 : index
    %2 = vector.load %arg2[%c0_1, %c0_2] : memref<8x4xf32, #tpu.memory_space<vmem>>, vector<8x4xf32>
    %3 = arith.truncf %2 : vector<8x4xf32> to vector<8x4xbf16>
    %c0_3 = arith.constant 0 : index
    %c0_4 = arith.constant 0 : index
    %4 = vector.load %arg3[%c0_3, %c0_4] : memref<16x256xbf16, #tpu.memory_space<vmem>>, vector<16x256xbf16>
    %cst = arith.constant dense<0.000000e+00> : vector<8x256xf32>
    %5 = tpu.matmul %1, %4, %cst {dimension_numbers = #tpu.dot_dimension_numbers<[1], [0], [0], [1], [0, 0, 1, 1], [], []>} : vector<8x16xbf16>, vector<16x256xbf16>, vector<8x256xf32> -> vector<8x256xf32>
    %c0_5 = arith.constant 0 : index
    %c0_6 = arith.constant 0 : index
    %6 = vector.load %arg4[%c0_5, %c0_6] : memref<1x256xf32, #tpu.memory_space<vmem>>, vector<1x256xf32>
    %7 = vector.broadcast %6 : vector<1x256xf32> to vector<8x256xf32>
    %8 = arith.addf %5, %7 : vector<8x256xf32>
    %cst_7 = arith.constant 0.00999999977 : f32
    %9 = vector.broadcast %cst_7 : f32 to vector<8x256xf32>
    %10 = arith.mulf %9, %8 : vector<8x256xf32>
    %11 = arith.maximumf %8, %10 : vector<8x256xf32>
    %c0_8 = arith.constant 0 : index
    %c0_9 = arith.constant 0 : index
    %12 = vector.load %arg6[%c0_8, %c0_9] : memref<4x128xbf16, #tpu.memory_space<vmem>>, vector<4x128xbf16>
    %cst_10 = arith.constant dense<0.000000e+00> : vector<8x128xf32>
    %13 = tpu.matmul %3, %12, %cst_10 {dimension_numbers = #tpu.dot_dimension_numbers<[1], [0], [0], [1], [0, 0, 1, 1], [], []>} : vector<8x4xbf16>, vector<4x128xbf16>, vector<8x128xf32> -> vector<8x128xf32>
    %14 = arith.truncf %11 : vector<8x256xf32> to vector<8x256xbf16>
    %c0_11 = arith.constant 0 : index
    %c0_12 = arith.constant 0 : index
    %15 = vector.load %arg5[%c0_11, %c0_12] : memref<256x128xbf16, #tpu.memory_space<vmem>>, vector<256x128xbf16>
    %cst_13 = arith.constant dense<0.000000e+00> : vector<8x128xf32>
    %16 = tpu.matmul %14, %15, %cst_13 {dimension_numbers = #tpu.dot_dimension_numbers<[1], [0], [0], [1], [0, 0, 1, 1], [], []>} : vector<8x256xbf16>, vector<256x128xbf16>, vector<8x128xf32> -> vector<8x128xf32>
    %17 = arith.addf %16, %13 : vector<8x128xf32>
    %c0_14 = arith.constant 0 : index
    %c0_15 = arith.constant 0 : index
    %18 = vector.load %arg7[%c0_14, %c0_15] : memref<1x128xf32, #tpu.memory_space<vmem>>, vector<1x128xf32>
    %19 = vector.broadcast %18 : vector<1x128xf32> to vector<8x128xf32>
    %20 = arith.addf %17, %19 : vector<8x128xf32>
    %cst_16 = arith.constant 0.00999999977 : f32
    %21 = vector.broadcast %cst_16 : f32 to vector<8x128xf32>
    %22 = arith.mulf %21, %20 : vector<8x128xf32>
    %23 = arith.maximumf %20, %22 : vector<8x128xf32>
    %c0_17 = arith.constant 0 : index
    %c0_18 = arith.constant 0 : index
    %24 = vector.load %arg8[%c0_17, %c0_18] : memref<1x128xbf16, #tpu.memory_space<vmem>>, vector<1x128xbf16>
    %25 = arith.truncf %23 : vector<8x128xf32> to vector<8x128xbf16>
    %cst_19 = arith.constant dense<0.000000e+00> : vector<1x8xf32>
    %26 = tpu.matmul %24, %25, %cst_19 {dimension_numbers = #tpu.dot_dimension_numbers<[1], [1], [0], [0], [0, 0, 1, 0], [], []>} : vector<1x128xbf16>, vector<8x128xbf16>, vector<1x8xf32> -> vector<1x8xf32>
    %c0_20 = arith.constant 0 : index
    %27 = memref.load %arg9[%c0_20] : memref<1xf32, #tpu.memory_space<smem>>
    %28 = vector.broadcast %27 : f32 to vector<1x8xf32>
    %29 = arith.addf %26, %28 : vector<1x8xf32>
    %c0_21 = arith.constant 0 : index
    %c0_22 = arith.constant 0 : index
    %30 = vector.load %arg10[%c0_21, %c0_22] : memref<1x8xf32, #tpu.memory_space<vmem>>, vector<1x8xf32>
    tpu.vector_store %arg10[%c0_21, %c0_22], %29 {strides = array<i32>} : memref<1x8xf32, #tpu.memory_space<vmem>>, vector<1x8xf32>,
    return
  }
  func.func @transform_0(%arg0: i32) -> (i32, i32) {
    %c0_i32 = arith.constant 0 : i32
    %c0_i32_0 = arith.constant 0 : i32
    return %arg0, %c0_i32 : i32, i32
  }
  func.func @transform_1(%arg0: i32) -> (i32, i32) {
    %c0_i32 = arith.constant 0 : i32
    %c0_i32_0 = arith.constant 0 : i32
    return %arg0, %c0_i32 : i32, i32
  }
  func.func @transform_2(%arg0: i32) -> (i32, i32) {
    %c0_i32 = arith.constant 0 : i32
    %c0_i32_0 = arith.constant 0 : i32
    %c0_i32_1 = arith.constant 0 : i32
    return %c0_i32, %c0_i32_0 : i32, i32
  }
  func.func @transform_3(%arg0: i32) -> (i32, i32) {
    %c0_i32 = arith.constant 0 : i32
    %c0_i32_0 = arith.constant 0 : i32
    %c0_i32_1 = arith.constant 0 : i32
    return %c0_i32, %c0_i32_0 : i32, i32
  }
  func.func @transform_4(%arg0: i32) -> (i32, i32) {
    %c0_i32 = arith.constant 0 : i32
    %c0_i32_0 = arith.constant 0 : i32
    %c0_i32_1 = arith.constant 0 : i32
    return %c0_i32, %c0_i32_0 : i32, i32
  }
  func.func @transform_5(%arg0: i32) -> (i32, i32) {
    %c0_i32 = arith.constant 0 : i32
    %c0_i32_0 = arith.constant 0 : i32
    %c0_i32_1 = arith.constant 0 : i32
    return %c0_i32, %c0_i32_0 : i32, i32
  }
  func.func @transform_6(%arg0: i32) -> (i32, i32) {
    %c0_i32 = arith.constant 0 : i32
    %c0_i32_0 = arith.constant 0 : i32
    %c0_i32_1 = arith.constant 0 : i32
    return %c0_i32, %c0_i32_0 : i32, i32
  }
  func.func @transform_7(%arg0: i32) -> (i32, i32) {
    %c0_i32 = arith.constant 0 : i32
    %c0_i32_0 = arith.constant 0 : i32
    %c0_i32_1 = arith.constant 0 : i32
    return %c0_i32, %c0_i32_0 : i32, i32
  }
  func.func @transform_8(%arg0: i32) -> i32 {
    %c0_i32 = arith.constant 0 : i32
    %c0_i32_0 = arith.constant 0 : i32
    return %c0_i32 : i32
  }
  func.func @transform_9(%arg0: i32) -> (i32, i32) {
    %c0_i32 = arith.constant 0 : i32
    %c0_i32_0 = arith.constant 0 : i32
    return %c0_i32, %arg0 : i32, i32
  }
}

</mosaic_0001>

<bundles_post_ra>
// kernel: tpu_custom_call.1
= control target key start
LH: loop header
LB: loop body
LE: loop exit
PB: predicated region body
PF: predicated region fallthrough
CT: control target
= control target key end

     0   :  { %15 = vsyncpa [#allocation4], 0  ;;  %s712_s0 = inlined_call_operand.hbm [shape: f32[8,16], index: 0, kind: input, shape index: {}]   ;;  %s713_s1 = inlined_call_operand.vmem [shape: f32[8,4], index: 1, kind: input, shape index: {}]   ;;  %s714_s2 = inlined_call_operand.vmem [shape: bf16[16,256], index: 2, kind: input, shape index: {}]   ;;  %s715_s3 = inlined_call_operand.vmem [shape: f32[1,256], index: 3, kind: input, shape index: {}]   ;;  %s716_s4 = inlined_call_operand.hbm [shape: bf16[256,128], index: 4, kind: input, shape index: {}]   ;;  %s717_s5 = inlined_call_operand.vmem [shape: bf16[4,128], index: 5, kind: input, shape index: {}]   ;;  %s718_s6 = inlined_call_operand.vmem [shape: f32[1,128], index: 6, kind: input, shape index: {}]   ;;  %s719_s7 = inlined_call_operand.vmem [shape: bf16[1,128], index: 7, kind: input, shape index: {}]   ;;  %s720_s8 = inlined_call_operand.<no memory space> [shape: f32[1], index: 8, kind: input, shape index: {}]   ;;  %s721_s9 = inlined_call_operand.hbm [shape: f32[1,8], index: 9, kind: output, shape index: {}]  }
   0x1   :  { %16 = vsyncpa [#allocation7], 0 }
   0x2   :  { %17 = vsyncpa [#allocation5], 0  ;;  %s587_s30 = smov [#allocation3]   ;;  %s588_s11 = smov [#allocation6]  }
   0x3   :  { %s24_s10 = sshll.u32 %s587_s30, 4  ;;  %s39_s12 = sshll.u32 %s588_s11, 4  ;;  %s25_s10 = int_to_ptr.vmem [resolvable:$true] %s24_s10  ;;  %s645_s12 = int_to_ptr.vmem [resolvable:$true] %s39_s12 }
   0x4   :  { %s515_s15 = scalar_lea.hbm %s712_s0, 128 }
   0x5   :  { %p516_p0 = scmp.ne.s32.totalorder %s712_s0, %s515_s15  ;;  %p519_p1 = scmp.lt.u32.totalorder %s515_s15, %s712_s0 }
   0x7   :  { %p521_p2 = pnand %p519_p1, %p516_p0 }
   0x9   :  { %524 = shalt.err (!%p521_p2)
}
   0xa   :  { %s525_s20 = scalar_lea.vmem %s25_s10, 128  ;;  %p530_p4 = scmp.lt.s32.totalorder %s25_s10, %s25_s10 }
   0xb   :  { %p526_p3 = scmp.ne.s32.totalorder %s25_s10, %s525_s20  ;;  %p531_p5 = scmp.lt.s32.totalorder %s525_s20, %s525_s20 }
   0xd   :  { %p532_p6 = por %p531_p5, %p530_p4 }
   0xf   :  { %p533_p7 = pnand %p532_p6, %p526_p3 }
  0x11   :  { %536 = shalt.err (!%p533_p7)
}
  0x12   :  { %27 = dma.hbm_to_vmem [thread:$0]  %s712_s0, 128, %s25_s10, [#allocation4]  }
  0x13   :  { %s537_s25 = scalar_lea.hbm %s716_s4, 2048 }
  0x14   :  { %p538_p8 = scmp.ne.s32.totalorder %s716_s4, %s537_s25  ;;  %p541_p9 = scmp.lt.u32.totalorder %s537_s25, %s716_s4 }
  0x16   :  { %p543_p10 = pnand %p541_p9, %p538_p8 }
  0x18   :  { %546 = shalt.err (!%p543_p10)
}
  0x19   :  { %s547_s30 = scalar_lea.vmem %s645_s12, 2048  ;;  %p552_p12 = scmp.lt.s32.totalorder %s645_s12, %s645_s12 }
  0x1a   :  { %p548_p11 = scmp.ne.s32.totalorder %s645_s12, %s547_s30  ;;  %p553_p13 = scmp.lt.s32.totalorder %s547_s30, %s547_s30 }
  0x1c   :  { %p554_p0 = por %p553_p13, %p552_p12 }
  0x1e   :  { %p555_p1 = pnand %p554_p0, %p548_p11 }
  0x20   :  { %558 = shalt.err (!%p555_p1)
}
  0x21   :  { %s589_s0 = smov 64   ;;  %s590_s10 = smov 4  }
  0x22   :  { %45 = dma.hbm_to_vmem [thread:$0]  %s716_s4, 2048, %s645_s12, [#allocation7], %s589_s0, %s589_s0, %s590_s10  }
  0x23   :  { %581 = dma.done.wait [#allocation4], 128  }
  0x24   :  { %582 = vsyncadd [#allocation4], 4294967168 }
  0x25   :  { %583 = dma.done.wait [#allocation7], 2048  }
  0x26   :  { %584 = vsyncadd [#allocation7], 4294965248  ;;  %v591_v0 = vmov 0   ;;  %v496_v1 = vld [vmem:[%s714_s2 + $0x4] ss:$8 sps:$4 sm:$0xff]   ;;  %vm89_vm0 = vcmask 130048   ;;  %v69_v26 = vlaneseq  ;;  %v370_v61 = vstv %s720_s8 }
  0x27   :  { %125 = vmatprep.mubr.bf16.mxu1 %v591_v0  ;;  %v498_v2 = vld [vmem:[%s714_s2] ss:$8 sps:$4 sm:$0xff]   ;;  %93 = vmatprep.subr.bf16.mxu1 %v496_v1  ;;  %v501_v7 = vld [vmem:[#allocation6 + $0x48] sm:$0xff]   ;;  %v503_v9 = vld [vmem:[#allocation6 + $0x50] sm:$0xff]   ;;  %vm143_vm1 = vcmask 1041408   ;;  %v592_v22 = vmov 0.0  }
  0x28   :  { %v61_v3 = vld [vmem:[#allocation3] sm:$0xff]  ;;  %v499_v5 = vld [vmem:[#allocation6 + $0x40] sm:$0xff]   ;;  %94 = vmatpush1.bf16.msra.mxu1 %v498_v2  ;;  %v502_v8 = vld [vmem:[#allocation6 + $0x8] sm:$0xff]   ;;  %vm593_vm2 = vmmov 0   ;;  %vm139_vm3 = vcmask 31744   ;;  %v70_v27 = vshrl.u32 %v69_v26, 7 }
  0x29   :  { %v62_v4 = vpack.c.bf16 %v61_v3, %v61_v3  ;;  %v500_v6 = vld [vmem:[#allocation6] sm:$0xff]   ;;  %452 = vmatprep.subr.bf16.mxu0 %v499_v5  ;;  %v504_v10 = vld [vmem:[#allocation6 + $0x10] sm:$0xff]   ;;  %v505_v11 = vld [vmem:[#allocation6 + $0x58] sm:$0xff]   ;;  %476 = vmatprep.subr.bf16.mxu1 %v592_v22  ;;  %s594_s24 = smov [#allocation8]   ;;  %vm411_vm4 = vcmask 57344  }
  0x2a   :  { %453 = vmatpush3.bf16.msra.mxu0 %v500_v6  ;;  %v506_v12 = vld [vmem:[#allocation6 + $0x18] sm:$0xff]   ;;  %v507_v13 = vld [vmem:[#allocation6 + $0x60] sm:$0xff]   ;;  %v509_v15 = vld [vmem:[#allocation6 + $0x68] sm:$0xff]   ;;  %v71_v28 = vsub.s32 0, %v70_v27  ;;  %v75_v30 = vsub.s32 1, %v70_v27  ;;  %s419_s25 = sshll.u32 %s594_s24, 4  ;;  %s420_s25 = int_to_ptr.vmem [resolvable:$true] %s419_s25 }
  0x2b   :  { %431 = vmatmul.mubr.msk.bf16.vlgmr.msra.gmra.mrb[0].mxu1 %vm89_vm0, %v62_v4  ;;  %454 = vmatprep.subr.bf16.mxu0 %v501_v7  ;;  %v508_v14 = vld [vmem:[#allocation6 + $0x20] sm:$0xff]   ;;  %v510_v16 = vld [vmem:[#allocation6 + $0x28] sm:$0xff]   ;;  %v511_v17 = vld [vmem:[#allocation6 + $0x70] sm:$0xff]   ;;  %s563_s26 = scalar_lea.vmem %s420_s25, 32  ;;  %p564_p3 = scmp.lt.s32.totalorder %s420_s25, %s420_s25 }
  0x2c   :  { %v512_v18 = vld [vmem:[#allocation6 + $0x30] sm:$0xff]   ;;  %v513_v19 = vld [vmem:[#allocation6 + $0x78] sm:$0xff]   ;;  %478 = vmatprep.mubr.msk.bf16.mxu1 %vm593_vm2, %v592_v22 }
  0x2d   :  { %v138_v20 = vld [vmem:[%s717_s5] sm:$0x3] }
  0x2e   :  { %455 = vmatpush3.bf16.msra.mxu0 %v502_v8  ;;  %v514_v21 = vld [vmem:[#allocation6 + $0x38] sm:$0xff]   ;;  %v145_v23 = vsel %vm143_vm1, %v138_v20, 0 }
  0x2f   :  { %456 = vmatprep.subr.bf16.mxu0 %v503_v9  ;;  %477 = vmatpush3.bf16.msra.mxu1 %v145_v23  ;;  %v63_v24 = vld [vmem:[%s713_s1] sm:$0xff] }
  0x30   :  { %v64_v25 = vpack.c.bf16 %v63_v24, %v63_v24  ;;  %482 = vmatprep.subr.bf16.mxu1 %v592_v22  ;;  %v67_v29 = vld [vmem:[%s715_s3] sm:$0x3] }
  0x31   :  { %v72_v31 = vrot.slane %v67_v29, %v71_v28  ;;  %v76_v32 = vrot.slane %v67_v29, %v75_v30  ;;  %v449_v53 = vld [vmem:[%s718_s6] ss:$0 sm:$0xff]  ;;  %s559_s6 = scalar_lea.vmem %s420_s25, 16 }
  0x32   :  { %457 = vmatpush3.bf16.msra.mxu0 %v504_v10  ;;  %v367_v60 = vld [vmem:[%s719_s7] sm:$0x1]  ;;  %p560_p2 = scmp.ne.s32.totalorder %s420_s25, %s559_s6  ;;  %p565_p4 = scmp.lt.s32.totalorder %s563_s26, %s559_s6 }
  0x33   :  { %458 = vmatprep.subr.bf16.mxu0 %v505_v11  ;;  %479 = vmatmul.mubr.msk.bf16.vlgmr.msra.gmra.mrb[4].mxu1 %vm139_vm3, %v64_v25 }
  0x34   :  { %484 = vmatprep.mubr.msk.bf16.mxu1 %vm593_vm2, %v592_v22  ;;  %p566_p5 = por %p565_p4, %p564_p3 }
  0x36   :  { %459 = vmatpush3.bf16.msra.mxu0 %v506_v12  ;;  %p567_p6 = pnand %p566_p5, %p560_p2 }
  0x37   :  { %460 = vmatprep.subr.bf16.mxu0 %v507_v13 }
  0x3a   :  { %461 = vmatpush3.bf16.msra.mxu0 %v508_v14 }
  0x3b   :  { %462 = vmatprep.subr.bf16.mxu0 %v509_v15 }
  0x3e   :  { %463 = vmatpush3.bf16.msra.mxu0 %v510_v16 }
  0x3f   :  { %464 = vmatprep.subr.bf16.mxu0 %v511_v17 }
  0x42   :  { %465 = vmatpush3.bf16.msra.mxu0 %v512_v18 }
  0x43   :  { %466 = vmatprep.subr.bf16.mxu0 %v513_v19 }
  0x46   :  { %467 = vmatpush3.bf16.msra.mxu0 %v514_v21 }
  0xfe   :  { %v127_v33 = vpop.f32.mrb[0].mxu1 }
  0xff   :  { %v128_v34 = vadd.f32 %v127_v33, %v72_v31  ;;  %v129_v35 = vpop.f32.mrb[1].mxu1 }
 0x100   :  { %v130_v36 = vadd.f32 %v129_v35, %v76_v32  ;;  %v131_v37 = vpop.f32.mrb[2].mxu1 }
 0x101   :  { %v134_v38 = vmul.f32 0.01, %v128_v34  ;;  %v132_v39 = vpop.f32.mrb[3].mxu1 }
 0x102   :  { %v135_v40 = vmul.f32 0.01, %v130_v36 }
 0x103   :  { %v136_v41 = vmax.f32 %v128_v34, %v134_v38 }
 0x104   :  { %v137_v42 = vmax.f32 %v130_v36, %v135_v40 }
 0x105   :  { %v187_v44 = vpack.c.bf16 %v136_v41, %v136_v41 }
 0x106   :  { %v188_v43 = vpack.c.bf16 %v137_v42, %v137_v42  ;;  %v181_v45 = vpop.f32.mrb[4].mxu1 }
 0x107   :  { %v480_v46 = vpop.f32.mrb[5].mxu1 }
 0x108   :  { %349 = vmatprep.mubr.bf16.mxu0 %v188_v43  ;;  %v184_v47 = vpop.f32.mrb[6].mxu1 }
 0x109   :  { %350 = vmatmul.mubr.bf16.vlgmr.msra.gmra.mrb[0].mxu0 %v187_v44  ;;  %v481_v48 = vpop.f32.mrb[7].mxu1 }
 0x1dc   :  { %v468_v49 = vpop.f32.mrb[0].mxu0 }
 0x1dd   :  { %v469_v50 = vpop.f32.mrb[1].mxu0 }
 0x1de   :  { %v470_v51 = vadd.f32 %v469_v50, %v468_v49  ;;  %v471_v52 = vpop.f32.mrb[2].mxu0 }
 0x1df   :  { %v472_v54 = vpop.f32.mrb[3].mxu0 }
 0x1e0   :  { %v352_v55 = vadd.f32 %v470_v51, %v181_v45 }
 0x1e2   :  { %v364_v56 = vadd.f32 %v449_v53, %v352_v55 }
 0x1e4   :  { %v365_v57 = vmul.f32 0.01, %v364_v56 }
 0x1e6   :  { %v366_v58 = vmax.f32 %v364_v56, %v365_v57 }
 0x1e8   :  { %v368_v59 = vpack.c.bf16 %v366_v58, %v366_v58 }
 0x1ea   :  { %483 = vmatpush3.bf16.xpose.msra.mxu1 %v368_v59 }
 0x1f1   :  { %485 = vmatmul.mubr.bf16.vlgmr.msra.gmra.mrb[8].mxu1 %v367_v60 }
 0x2c4   :  { %v405_v62 = vpop.f32.mrb[8].mxu1 }
 0x2c5   :  { %v406_v63 = vadd.f32 %v405_v62, %v370_v61  ;;  %v486_v0 = vpop.f32.mrb[9].mxu1 }
 0x2c6   :  { %v408_v1 = vpop.f32.mrb[10].mxu1 }
 0x2c7   :  { %v487_v2 = vpop.f32.mrb[11].mxu1  ;;  %412 = vst.msk [vmem:[#allocation8] sm:$0x1] %vm411_vm4, %v406_v63 }
 0x2c8   :  { %570 = shalt.err (!%p567_p6)
}
 0x2c9   :  { %s571_s27 = scalar_lea.hbm %s721_s9, 16 }
 0x2ca   :  { %p572_p7 = scmp.ne.s32.totalorder %s721_s9, %s571_s27  ;;  %p575_p8 = scmp.lt.u32.totalorder %s571_s27, %s721_s9 }
 0x2cc   :  { %p577_p9 = pnand %p575_p8, %p572_p7 }
 0x2ce   :  { %580 = shalt.err (!%p577_p9)
}
 0x2cf   :  { %422 = dma.vmem_to_hbm [thread:$0]  %s420_s25, 16, %s721_s9, [#allocation5]  }
 0x2d0   :  { %585 = dma.done.wait [#allocation5], 16  }
 0x2d1   :  { %586 = vsyncadd [#allocation5], 4294967280 }
 0x2d2   :  { %426 = vsyncpa [#allocation4], 1 }
 0x2d3   :  { %427 = vsyncpa [#allocation7], 1 }
 0x2d4   :  { %428 = vsyncpa [#allocation5], 1 }

</bundles_post_ra>
